<compile_context>
chip_gen: v7x
topology: tpu7x:2x2x1
jax: 0.10.0
libtpu: 0.0.40
codegen_flags: <defaults>
</compile_context>

<pallas_src>
import jax
import jax.numpy as jnp
from jax.experimental import pallas as pl
from jax.experimental.pallas import tpu as pltpu


def _round_up(x, m):
    return ((x + m - 1) // m) * m


def _derive_vmem_limit(default=48 * 1024 * 1024):
    """Per-chip scoped-VMEM budget: ~3/4 of physical VMEM (v5e/v6e 128 MiB ->
    96 MiB, v7x 64 MiB -> 48 MiB). Falls back to a value safe everywhere."""
    try:
        cap = getattr(pltpu.get_tpu_info(), "vmem_capacity_bytes", None)
        if cap:
            return int(cap) * 3 // 4
    except Exception:
        pass
    return default


# --------------------------------------------------------------------------
# Kernel A: hidden = relu(feat @ Wfc + bfc)
#   feat: (tb, tk) bf16   Wfc: (tk, d_pad) bf16   bfc: (1, d_pad) f32
#   grid = (batch tiles, K tiles); f32 accumulator in VMEM scratch.
# --------------------------------------------------------------------------
def _fc_relu_kernel(feat_ref, wfc_ref, bfc_ref, hid_ref, acc_ref):
    kstep = pl.program_id(1)

    @pl.when(kstep == 0)
    def _():
        acc_ref[...] = jnp.zeros_like(acc_ref)

    acc_ref[...] += jnp.dot(feat_ref[...], wfc_ref[...],
                            preferred_element_type=jnp.float32)

    @pl.when(kstep == pl.num_programs(1) - 1)
    def _():
        h = jnp.maximum(acc_ref[...] + bfc_ref[...], 0.0)
        hid_ref[...] = h.astype(hid_ref.dtype)


# --------------------------------------------------------------------------
# Kernel B: pred = sigmoid(hidden @ E^T + ent_bias)
#   hidden: (tb, d_pad) bf16   ent tile: (te, d_pad) bf16 (row-major, no
#   host transpose)   ent_bias: (1, te) f32   out: (tb, te) f32
#   grid = (entity tiles OUTER, batch tiles INNER) -> E streamed exactly once.
# --------------------------------------------------------------------------
def _score_kernel(hid_ref, ent_ref, ebias_ref, out_ref):
    logits = jax.lax.dot_general(
        hid_ref[...], ent_ref[...],
        dimension_numbers=(((1,), (1,)), ((), ())),
        preferred_element_type=jnp.float32)
    logits = logits + ebias_ref[...]
    # sigmoid as EUP exp + approx reciprocal (keeps the divide off the VALU).
    out_ref[...] = pl.reciprocal(1.0 + jnp.exp(-logits),
                                 approx=True).astype(out_ref.dtype)


def conve_forward_pallas(batch_inputs, entity_emb, relation_emb,
                         conv_w, conv_b, fc_w, fc_b, ent_bias,
                         *, k_w, k_h, kernel_size,
                         tb=None, te=None, tk=None):
    B = batch_inputs.shape[0]
    num_ent, dim = entity_emb.shape
    C, ksz, _ = conv_w.shape
    assert dim == k_w * k_h, "ConvE requires dim == k_w * k_h"
    assert ksz == kernel_size

    # ---- glue: gathers + torch-equivalent reshape to the (1, 2*k_w, k_h) image
    e = entity_emb[batch_inputs[:, 0]]                         # (B, dim)
    r = relation_emb[batch_inputs[:, 1]]                       # (B, dim)
    stacked = jnp.stack([e, r], axis=1)                        # (B, 2, dim)
    img = jnp.transpose(stacked, (0, 2, 1)).reshape(B, 1, 2 * k_w, k_h)

    # ---- glue: tiny conv + ReLU + (C,H,W) flatten (negligible FLOPs in XLA)
    conv = jax.lax.conv_general_dilated(
        img, conv_w[:, None, :, :], (1, 1), "VALID",
        dimension_numbers=("NCHW", "OIHW", "NCHW"),
        precision=jax.lax.Precision.HIGHEST)
    conv = jnp.maximum(conv + conv_b[None, :, None, None], 0.0)
    feat = conv.reshape(B, -1)                                 # (B, C*p) torch order
    flat_sz = feat.shape[1]

    # ---- tile selection: never fall back to full extents; pad every tiled axis
    d_pad = _round_up(dim, 128)
    tb = tb if tb is not None else min(_round_up(B, 8), 256)
    tk = tk if tk is not None else min(_round_up(flat_sz, 128), 1024)
    te = te if te is not None else min(_round_up(num_ent, 128), 1024)
    b_pad = _round_up(B, tb)
    f_pad = _round_up(flat_sz, tk)
    n_pad = _round_up(num_ent, te)
    nb, nk, ne = b_pad // tb, f_pad // tk, n_pad // te

    # ---- zero-pad + bf16 casts (matmul operands); padding is mathematically exact
    feat_p = jnp.pad(feat, ((0, b_pad - B), (0, f_pad - flat_sz))).astype(jnp.bfloat16)
    wfc_p = jnp.pad(fc_w.T, ((0, f_pad - flat_sz), (0, d_pad - dim))).astype(jnp.bfloat16)
    bfc_p = jnp.pad(fc_b.reshape(1, dim), ((0, 0), (0, d_pad - dim))).astype(jnp.float32)
    # TODO(synk): cache the bf16 (padded) entity table across forward calls.
    ent_p = jnp.pad(entity_emb, ((0, n_pad - num_ent), (0, d_pad - dim))).astype(jnp.bfloat16)
    ebias_p = jnp.pad(ent_bias.reshape(1, num_ent),
                      ((0, 0), (0, n_pad - num_ent))).astype(jnp.float32)

    vmem_limit = _derive_vmem_limit()

    # ---- kernel A: hidden = relu(feat @ Wfc + bfc), bf16 out (feeds kernel B)
    hidden = pl.pallas_call(
        _fc_relu_kernel,
        out_shape=jax.ShapeDtypeStruct((b_pad, d_pad), jnp.bfloat16),
        grid_spec=pltpu.PrefetchScalarGridSpec(
            num_scalar_prefetch=0,
            grid=(nb, nk),
            in_specs=[
                pl.BlockSpec((tb, tk), lambda i, kk: (i, kk)),
                pl.BlockSpec((tk, d_pad), lambda i, kk: (kk, 0)),
                pl.BlockSpec((1, d_pad), lambda i, kk: (0, 0)),
            ],
            out_specs=pl.BlockSpec((tb, d_pad), lambda i, kk: (i, 0)),
            scratch_shapes=[pltpu.VMEM((tb, d_pad), jnp.float32)],
        ),
        compiler_params=pltpu.CompilerParams(
            dimension_semantics=("parallel", "arbitrary"),
            vmem_limit_bytes=vmem_limit,
        ),
    )(feat_p, wfc_p, bfc_p)

    # ---- kernel B: pred = sigmoid(hidden @ E^T + bias); entity axis OUTER so
    # each (te, d_pad) entity tile is DMA'd exactly once.
    pred = pl.pallas_call(
        _score_kernel,
        out_shape=jax.ShapeDtypeStruct((b_pad, n_pad), jnp.float32),
        grid_spec=pltpu.PrefetchScalarGridSpec(
            num_scalar_prefetch=0,
            grid=(ne, nb),
            in_specs=[
                pl.BlockSpec((tb, d_pad), lambda j, i: (i, 0)),   # hidden tile
                pl.BlockSpec((te, d_pad), lambda j, i: (j, 0)),   # entity rows tile
                pl.BlockSpec((1, te), lambda j, i: (0, j)),       # entity bias tile
            ],
            out_specs=pl.BlockSpec((tb, te), lambda j, i: (i, j)),
        ),
        compiler_params=pltpu.CompilerParams(
            # both axes independent; a parallel axis keeps both v7x TCs busy
            dimension_semantics=("parallel", "parallel"),
            vmem_limit_bytes=vmem_limit,
        ),
    )(hidden, ent_p, ebias_p)

    return pred[:B, :num_ent]


# --------------------------------------------------------------------------
# Pure-JAX reference (mirrors the PyTorch ops 1:1, independent of the kernels)
# --------------------------------------------------------------------------
def _reference_forward(batch_inputs, entity_emb, relation_emb,
                       conv_w, conv_b, fc_w, fc_b, ent_bias,
                       *, k_w, k_h, kernel_size):
    B = batch_inputs.shape[0]
    e = entity_emb[batch_inputs[:, 0]]
    r = relation_emb[batch_inputs[:, 1]]
    stacked = jnp.stack([e, r], axis=1)                        # (B, 2, dim)
    img = jnp.transpose(stacked, (0, 2, 1)).reshape(B, 1, 2 * k_w, k_h)
    conv = jax.lax.conv_general_dilated(
        img, conv_w[:, None, :, :], (1, 1), "VALID",
        dimension_numbers=("NCHW", "OIHW", "NCHW"),
        precision=jax.lax.Precision.HIGHEST)
    conv = jnp.maximum(conv + conv_b[None, :, None, None], 0.0)
    feat = conv.reshape(B, -1)                                 # (C, H, W) flatten
    hidden = jnp.maximum(
        jnp.dot(feat, fc_w.T, precision=jax.lax.Precision.HIGHEST) + fc_b, 0.0)
    logits = jnp.dot(hidden, entity_emb.T,
                     precision=jax.lax.Precision.HIGHEST) + ent_bias[None, :]
    return jax.nn.sigmoid(logits)


if __name__ == "__main__":
    key = jax.random.PRNGKey(0)
    ks = jax.random.split(key, 8)

    # Small shapes consistent with the module (dim must equal k_w * k_h).
    num_entities = 256
    num_relations = 8             # relation table holds 2 * num_relations rows
    dim = 128
    k_w, k_h = 16, 8
    kernel_size = 3
    out_channels = 4
    batch = 16

    # xavier_normal_: std = sqrt(2 / (fan_in + fan_out))
    ent_std = (2.0 / (num_entities + dim)) ** 0.5
    rel_std = (2.0 / (2 * num_relations + dim)) ** 0.5
    entity_emb = ent_std * jax.random.normal(ks[0], (num_entities, dim), jnp.float32)
    relation_emb = rel_std * jax.random.normal(ks[1], (2 * num_relations, dim), jnp.float32)

    h_out = 2 * k_w - kernel_size + 1
    w_out = k_h - kernel_size + 1
    flat_sz = out_channels * h_out * w_out
    conv_w = 0.1 * jax.random.normal(ks[2], (out_channels, kernel_size, kernel_size),
                                     jnp.float32)
    conv_b = 0.1 * jax.random.normal(ks[3], (out_channels,), jnp.float32)
    fc_std = (2.0 / (flat_sz + dim)) ** 0.5
    fc_w = fc_std * jax.random.normal(ks[4], (dim, flat_sz), jnp.float32)
    fc_b = 0.1 * jax.random.normal(ks[5], (dim,), jnp.float32)
    ent_bias = jnp.zeros((num_entities,), jnp.float32)   # module inits bias to zeros

    heads = jax.random.randint(ks[6], (batch,), 0, num_entities)
    rels = jax.random.randint(ks[7], (batch,), 0, 2 * num_relations)
    batch_inputs = jnp.stack([heads, rels], axis=1).astype(jnp.int32)

    # Exercise multi-tile grids even at demo scale: 2x2 score grid, 3-step K grid.
    pred = conve_forward_pallas(batch_inputs, entity_emb, relation_emb,
                                conv_w, conv_b, fc_w, fc_b, ent_bias,
                                k_w=k_w, k_h=k_h, kernel_size=kernel_size,
                                tb=8, te=128, tk=256)
    pred = jax.block_until_ready(pred)

    ref = _reference_forward(batch_inputs, entity_emb, relation_emb,
                             conv_w, conv_b, fc_w, fc_b, ent_bias,
                             k_w=k_w, k_h=k_h, kernel_size=kernel_size)
    assert pred.shape == (batch, num_entities)
    max_err = float(jnp.max(jnp.abs(pred - ref)))
    # bf16 matmul operands + approx-reciprocal sigmoid: ~1e-3-level error expected
    assert max_err < 1e-2, max_err
    print("KERNEL_OK")
</pallas_src>

<mosaic_0001>
module attributes {stable_mosaic.version = 11 : i64} {
  func.func @_fc_relu_kernel(%arg0: i32, %arg1: i32, %arg2: memref<8x256xbf16, #tpu.memory_space<vmem>>, %arg3: memref<256x128xbf16, #tpu.memory_space<vmem>>, %arg4: memref<1x128xf32, #tpu.memory_space<vmem>>, %arg5: memref<8x128xbf16, #tpu.memory_space<vmem>>, %arg6: memref<8x128xf32, #tpu.memory_space<vmem>>) attributes {dimension_semantics = [#tpu.dimension_semantics<parallel>, #tpu.dimension_semantics<arbitrary>], iteration_bounds = array<i64: 2, 3>, scalar_prefetch = 0 : i64, scratch_operands = 1 : i64, tpu.core_type = #tpu.core_type<tc>, window_params = [{transform_indices = @transform_0, window_bounds = array<i64: 8, 256>}, {transform_indices = @transform_1, window_bounds = array<i64: 256, 128>}, {pipeline_mode = #tpu.pipeline_mode<synchronous>, transform_indices = @transform_2, window_bounds = array<i64: 1, 128>}, {transform_indices = @transform_3, window_bounds = array<i64: 8, 128>}]} {
    %c0_i32 = arith.constant 0 : i32
    %0 = arith.cmpi eq, %arg1, %c0_i32 : i32
    %1 = arith.extui %0 : i1 to i32
    %c0_i32_0 = arith.constant 0 : i32
    %2 = arith.cmpi ne, %1, %c0_i32_0 : i32
    scf.if %2 {
      %cst_9 = arith.constant 0.000000e+00 : f32
      %12 = vector.broadcast %cst_9 : f32 to vector<8x128xf32>
      %c0_10 = arith.constant 0 : index
      %c0_11 = arith.constant 0 : index
      %13 = vector.load %arg6[%c0_10, %c0_11] : memref<8x128xf32, #tpu.memory_space<vmem>>, vector<8x128xf32>
      tpu.vector_store %arg6[%c0_10, %c0_11], %12 {strides = array<i32>} : memref<8x128xf32, #tpu.memory_space<vmem>>, vector<8x128xf32>,
    } else {
    }
    %c0 = arith.constant 0 : index
    %c0_1 = arith.constant 0 : index
    %3 = vector.load %arg6[%c0, %c0_1] : memref<8x128xf32, #tpu.memory_space<vmem>>, vector<8x128xf32>
    %c0_2 = arith.constant 0 : index
    %c0_3 = arith.constant 0 : index
    %4 = vector.load %arg2[%c0_2, %c0_3] : memref<8x256xbf16, #tpu.memory_space<vmem>>, vector<8x256xbf16>
    %c0_4 = arith.constant 0 : index
    %c0_5 = arith.constant 0 : index
    %5 = vector.load %arg3[%c0_4, %c0_5] : memref<256x128xbf16, #tpu.memory_space<vmem>>, vector<256x128xbf16>
    %cst = arith.constant dense<0.000000e+00> : vector<8x128xf32>
    %6 = tpu.matmul %4, %5, %cst {dimension_numbers = #tpu.dot_dimension_numbers<[1], [0], [0], [1], [0, 0, 1, 1], [], []>} : vector<8x256xbf16>, vector<256x128xbf16>, vector<8x128xf32> -> vector<8x128xf32>
    %7 = arith.addf %3, %6 : vector<8x128xf32>
    %c0_6 = arith.constant 0 : index
    %c0_7 = arith.constant 0 : index
    %8 = vector.load %arg6[%c0_6, %c0_7] : memref<8x128xf32, #tpu.memory_space<vmem>>, vector<8x128xf32>
    tpu.vector_store %arg6[%c0_6, %c0_7], %7 {strides = array<i32>} : memref<8x128xf32, #tpu.memory_space<vmem>>, vector<8x128xf32>,
    %c2_i32 = arith.constant 2 : i32
    %9 = arith.cmpi eq, %arg1, %c2_i32 : i32
    %10 = arith.extui %9 : i1 to i32
    %c0_i32_8 = arith.constant 0 : i32
    %11 = arith.cmpi ne, %10, %c0_i32_8 : i32
    scf.if %11 {
      %c0_9 = arith.constant 0 : index
      %c0_10 = arith.constant 0 : index
      %12 = vector.load %arg6[%c0_9, %c0_10] : memref<8x128xf32, #tpu.memory_space<vmem>>, vector<8x128xf32>
      %c0_11 = arith.constant 0 : index
      %c0_12 = arith.constant 0 : index
      %13 = vector.load %arg4[%c0_11, %c0_12] : memref<1x128xf32, #tpu.memory_space<vmem>>, vector<1x128xf32>
      %14 = vector.broadcast %13 : vector<1x128xf32> to vector<8x128xf32>
      %15 = arith.addf %12, %14 : vector<8x128xf32>
      %cst_13 = arith.constant 0.000000e+00 : f32
      %16 = vector.broadcast %cst_13 : f32 to vector<8x128xf32>
      %17 = arith.maximumf %15, %16 : vector<8x128xf32>
      %18 = arith.truncf %17 : vector<8x128xf32> to vector<8x128xbf16>
      %c0_14 = arith.constant 0 : index
      %c0_15 = arith.constant 0 : index
      %19 = vector.load %arg5[%c0_14, %c0_15] : memref<8x128xbf16, #tpu.memory_space<vmem>>, vector<8x128xbf16>
      tpu.vector_store %arg5[%c0_14, %c0_15], %18 {strides = array<i32>} : memref<8x128xbf16, #tpu.memory_space<vmem>>, vector<8x128xbf16>,
    } else {
    }
    return
  }
  func.func @transform_0(%arg0: i32, %arg1: i32) -> (i32, i32) {
    %c0_i32 = arith.constant 0 : i32
    return %arg0, %arg1 : i32, i32
  }
  func.func @transform_1(%arg0: i32, %arg1: i32) -> (i32, i32) {
    %c0_i32 = arith.constant 0 : i32
    %c0_i32_0 = arith.constant 0 : i32
    return %arg1, %c0_i32 : i32, i32
  }
  func.func @transform_2(%arg0: i32, %arg1: i32) -> (i32, i32) {
    %c0_i32 = arith.constant 0 : i32
    %c0_i32_0 = arith.constant 0 : i32
    %c0_i32_1 = arith.constant 0 : i32
    return %c0_i32, %c0_i32_0 : i32, i32
  }
  func.func @transform_3(%arg0: i32, %arg1: i32) -> (i32, i32) {
    %c0_i32 = arith.constant 0 : i32
    %c0_i32_0 = arith.constant 0 : i32
    return %arg0, %c0_i32 : i32, i32
  }
}

</mosaic_0001>

<bundles_post_ra>
// kernel: tpu_custom_call.1
= control target key start
LH: loop header
LB: loop body
LE: loop exit
PB: predicated region body
PF: predicated region fallthrough
CT: control target
= control target key end

     0   :  { %8 = vsyncpa [#allocation4], 0  ;;  %s1385_s0 = inlined_call_operand.hbm [shape: bf16[16,768], index: 0, kind: input, shape index: {}]   ;;  %s1386_s1 = inlined_call_operand.hbm [shape: bf16[768,128], index: 1, kind: input, shape index: {}]   ;;  %s1387_s2 = inlined_call_operand.vmem [shape: f32[1,128], index: 2, kind: input, shape index: {}]   ;;  %s1388_s3 = inlined_call_operand.hbm [shape: bf16[16,128], index: 3, kind: output, shape index: {}]  }
   0x1   :  { %10 = vsyncpa [#allocation4 + $0x1], 0 }
   0x2   :  { %11 = vsyncpa [#allocation7], 0 }
   0x3   :  { %13 = vsyncpa [#allocation7 + $0x1], 0 }
   0x4   :  { %14 = vsyncpa [#allocation5], 0 }
   0x5   :  { %16 = vsyncpa [#allocation5 + $0x1], 0  ;;  %s1020_s12 = smov 0   ;;  %s1022_s13 = smov 0  }
   0x6   :  { %s1024_s14 = smov 0   ;;  %s1026_s15 = smov 0  }
   0x7   :  { %s1028_s16 = smov 0   ;;  %s1030_s17 = smov 0  }
   0x8   :  { %s1032_s18 = smov 0   ;;  %s1034_s19 = smov 0  }
   0x9   :  { %s1036_s20 = smov 0   ;;  %s1038_s21 = smov 0  }
   0xa   :  { %s1040_s22 = smov 0   ;;  %s1042_s23 = smov 0  }
   0xb   :  { %s1044_s24 = smov 0   ;;  %s1046_s25 = smov 0  }
   0xc LB: > { %1398 = sst [smem:[#allocation12_spill]] %s948_s14  ;;  %s1389_s26 = sadd.s32 4294967295, %s992_s25   ;;  %s992_s25 = sphi %s1046_s25, %s22_s25   ;;  %s988_s24 = sphi %s1044_s24, %s1430_s24   ;;  %s984_s23 = sphi %s1042_s23, %s1439_s23   ;;  %s980_s22 = sphi %s1040_s22, %s1428_s22   ;;  %s976_s21 = sphi %s1038_s21, %s1438_s21   ;;  %s972_s20 = sphi %s1036_s20, %s1427_s20   ;;  %s968_s19 = sphi %s1034_s19, %s1437_s19   ;;  %s964_s18 = sphi %s1032_s18, %s1436_s18   ;;  %s960_s17 = sphi %s1030_s17, %s1435_s17   ;;  %s956_s16 = sphi %s1028_s16, %s1434_s16   ;;  %s952_s15 = sphi %s1026_s15, %s1433_s15   ;;  %s948_s14 = sphi %s1024_s14, %s1424_s14   ;;  %s944_s13 = sphi %s1022_s13, %s1432_s13   ;;  %s940_s12 = sphi %s1020_s12, %s1431_s12  }
   0xd   : > { %1399 = sst [smem:[#allocation13_spill]] %s972_s20  ;;  %s31_s28 = sadd.s32 1, %s984_s23 }
   0xe   : > { %1400 = sst [smem:[#allocation14_spill]] %s988_s24  ;;  %s34_s29 = sadd.s32 1, %s988_s24 }
   0xf   : > { %p32_p0 = scmp.ge.s32.totalorder %s31_s28, 3  ;;  %s43_s30 = sadd.s32 1, %s972_s20 }
  0x10   : > { %p50_p1 = scmp.ne.s32.totalorder %s972_s20, %s968_s19  ;;  %p51_p2 = scmp.eq.s32.totalorder %s992_s25, 0 }
  0x11   : > { %s1441_s28 = smov (%p32_p0, %s31_s28), 0  ;;  %s1443_s29 = smov (!%p32_p0, %s34_s29), %s988_s24 }
  0x12   : > { %1401 = sst [smem:[#allocation15_spill]] %s1441_s28  ;;  %s39_s4 = ssub.s32 %s984_s23, %s1441_s28 }
  0x13   : > { %p1103_p3 = por %p51_p2, %p50_p1  ;;  %p36_p4 = scmp.ge.s32.totalorder %s1443_s29, 2 }
  0x14   : > { %p56_p5 = scmp.ne.s32.totalorder %s968_s19, %s964_s18  ;;  %p1110_p6 = scmp.eq.s32.totalorder %s1389_s26, 0 }
  0x15   : > { %p67_p7 = scmp.eq.s32.totalorder %s39_s4, 0  ;;  %s1445_s29 = smov (%p36_p4, %s1443_s29), 0 }
  0x16   : > { %1404 = sst [smem:[#allocation16_spill]] %s1445_s29  ;;  %p1118_p8 = por %p1110_p6, %p56_p5 }
  0x17   : > { %s69_s8 = sadd.s32 1, %s960_s17  ;;  %s38_s9 = ssub.s32 %s988_s24, %s1445_s29 }
  0x18   : > { %s1405_s7 = scalar_select %p1118_p8, 1, 0 }
  0x19   : > { %p76_p9 = scmp.ne.s32.totalorder %s960_s17, %s956_s16  ;;  %s40_s10 = sor.u32 %s39_s4, %s38_s9 }
  0x1a   : > { %p82_p10 = scmp.ne.s32.totalorder %s956_s16, %s952_s15  ;;  %p41_p11 = scmp.eq.s32.totalorder %s40_s10, 0 }
  0x1b   : > { %p1131_p12 = por %p76_p9, %p51_p2  ;;  %p114_p0 = scmp.eq.s32.totalorder %s38_s9, 0 }
  0x1c   : > { %s1136_s18 = scalar_select %p67_p7, %s960_s17, %s69_s8  }
  0x1d   : > { %s1139_s27 = scalar_select %p41_p11, %s972_s20, %s43_s30  }
  0x1e   : > { %1407 = sst [smem:[#allocation17_spill]] %s1136_s18  ;;  %p1143_p13 = por %p82_p10, %p1110_p6 }
  0x1f   : > { %1408 = sst [smem:[#allocation18_spill]] %s1139_s27  ;;  %s116_s15 = sadd.s32 1, %s948_s14 }
  0x20   : > { %s1409_s26 = scalar_select %p1143_p13, 1, 0 }
  0x21   : > { %p126_p1 = scmp.ne.s32.totalorder %s948_s14, %s944_s13  ;;  %s1411_s10 = sadd.s32 4294967295, %s992_s25  }
  0x22   : > { %s1151_s4 = scalar_select %p114_p0, %s948_s14, %s116_s15  }
  0x23   : > { %p127_p2 = scmp.eq.s32.totalorder %s1411_s10, 5  ;;  %p132_p4 = scmp.ne.s32.totalorder %s944_s13, %s940_s12 }
  0x24   : > { %1410 = sst [smem:[#allocation19_spill]] %s1151_s4  ;;  %s1412_s8 = sadd.s32 4294967294, %s992_s25  }
  0x25   : > { %p133_p5 = scmp.eq.s32.totalorder %s1412_s8, 5  ;;  %p1159_p7 = por %p127_p2, %p126_p1 }
  0x26   : > { %p647_p6 = scmp.lt.s32.totalorder %s992_s25, 6  ;;  %s156_s9 = sand.u32 1, %s972_s20  }
  0x27   : > { %s1413_s30 = scalar_select %p1159_p7, 1, 0 }
  0x28   : > { %p1164_p9 = por %p133_p5, %p132_p4  ;;  %s571_s29 = sshll.u32 %s156_s9, 3 }
  0x29   : > { %s572_s28 = sshll.u32 %s984_s23, 1  ;;  %s629_s15 = smul.u32 6, %s988_s24 }
  0x2a   : > { %s1414_s6 = scalar_select %p1164_p9, 1, 0 }
  0x2b   : > { %s160_s27 = scalar_lea.vmem [#allocation3], %s571_s29  ;;  %p1175_p10 = pnand %p647_p6, %p1103_p3 }
  0x2c   : > { %s170_s18 = sshll.u32 %s160_s27, 4  ;;  %s166_s8 = sadd.s32 %s629_s15, %s572_s28  ;;  %s1171_s18 = int_to_ptr.vmem [resolvable:$true] %s170_s18 }
  0x2d   : > { %p1181_p11 = pnand %p647_p6, %p1131_p12  ;;  %s573_s20 = sshll.u32 %s166_s8, 6 }
  0x2e   : > { %s1188_s27 = scalar_lea.hbm %s1385_s0, %s573_s20  ;;  %s157_s29 = scalar_lea.sflag [#allocation4], %s156_s9 }
  0x2f   : > { %s782_s5 = scalar_lea.hbm %s1188_s27, 128  ;;  %p784_p0 = pneg %p1175_p10 }
  0x30   : > { %p783_p3 = scmp.ne.s32.totalorder %s1188_s27, %s782_s5  ;;  %s787_s15 = scalar_lea.hbm %s1385_s0, 768 }
  0x31   : > { %p788_p2 = scmp.lt.u32.totalorder %s1188_s27, %s1385_s0  ;;  %p789_p4 = scmp.lt.u32.totalorder %s787_s15, %s782_s5 }
  0x32   : > { %p785_p12 = pnand %p784_p0, %p783_p3  ;;  %p791_p6 = scmp.lt.u32.totalorder %s782_s5, %s1188_s27 }
  0x33   : > { %p790_p5 = por %p789_p4, %p788_p2 }
  0x34   : > { %p786_p1 = pneg %p785_p12 }
  0x35   : > { %p792_p9 = por %p791_p6, %p790_p5 }
  0x37   : > { %p793_p7 = pnand %p792_p9, %p786_p1 }
  0x39   : > { %796 = shalt.err (!%p793_p7)
}
  0x3a   : > { %s797_s24 = scalar_lea.vmem %s1171_s18, 128  ;;  %s994_s9 = smov [#allocation3]  }
  0x3b   : > { %p798_p3 = scmp.ne.s32.totalorder %s1171_s18, %s797_s24  ;;  %s802_s8 = sshll.u32 %s994_s9, 4  ;;  %s803_s8 = int_to_ptr.vmem [resolvable:$false] %s802_s8 }
  0x3c   : > { %s804_s28 = scalar_lea.vmem %s803_s8, 256  ;;  %p805_p8 = scmp.lt.s32.totalorder %s1171_s18, %s803_s8 }
  0x3d   : > { %p800_p12 = pnand %p798_p3, %p784_p0  ;;  %p806_p2 = scmp.lt.s32.totalorder %s804_s28, %s797_s24 }
  0x3f   : > { %p801_p13 = pneg %p800_p12  ;;  %p807_p4 = por %p806_p2, %p805_p8 }
  0x41   : > { %p808_p5 = pnand %p807_p4, %p801_p13 }
  0x43   : > { %811 = shalt.err (!%p808_p5)
}
  0x44   : > { %639 = dma.hbm_to_vmem [thread:$0]  (!%p1175_p10), %s1188_s27, 128, %s1171_s18, %s157_s29  }
  0x45   : > { %p577_p7 = scmp.ge.s32.totalorder %s992_s25, 1  ;;  %p196_p9 = scmp.lt.s32.totalorder %s992_s25, 7 }
  0x46   : > { %s177_s5 = sand.u32 1, %s960_s17   ;;  %s606_s11 = sshll.u32 %s984_s23, 11 }
  0x47   : > { %p1219_p0 = pnand %p577_p7, %p196_p9  ;;  %s574_s14 = sshll.u32 %s177_s5, 7 }
  0x48   : > { %s1226_s24 = scalar_lea.hbm %s1386_s1, %s606_s11  ;;  %s181_s9 = scalar_lea.vmem [#allocation6], %s574_s14 }
  0x49   : > { %s188_s18 = sshll.u32 %s181_s9, 4  ;;  %s1230_s27 = scalar_lea.sflag [#allocation7], %s177_s5  ;;  %s1228_s18 = int_to_ptr.vmem [resolvable:$true] %s188_s18 }
  0x4a   : > { %s812_s29 = scalar_lea.hbm %s1226_s24, 2048  ;;  %p814_p13 = pneg %p1181_p11 }
  0x4b   : > { %p813_p8 = scmp.ne.s32.totalorder %s1226_s24, %s812_s29  ;;  %s817_s11 = scalar_lea.hbm %s1386_s1, 6144 }
  0x4c   : > { %p818_p6 = scmp.lt.u32.totalorder %s1226_s24, %s1386_s1  ;;  %p819_p3 = scmp.lt.u32.totalorder %s817_s11, %s812_s29 }
  0x4d   : > { %p815_p10 = pnand %p814_p13, %p813_p8  ;;  %p821_p2 = scmp.lt.u32.totalorder %s812_s29, %s1226_s24 }
  0x4e   : > { %p820_p12 = por %p819_p3, %p818_p6 }
  0x4f   : > { %p816_p1 = pneg %p815_p10 }
  0x50   : > { %p822_p4 = por %p821_p2, %p820_p12 }
  0x52   : > { %p823_p5 = pnand %p822_p4, %p816_p1 }
  0x54   : > { %826 = shalt.err (!%p823_p5)
}
  0x55   : > { %s827_s5 = scalar_lea.vmem %s1228_s18, 2048  ;;  %s995_s14 = smov [#allocation6]  }
  0x56   : > { %p828_p7 = scmp.ne.s32.totalorder %s1228_s18, %s827_s5  ;;  %s832_s9 = sshll.u32 %s995_s14, 4  ;;  %s833_s9 = int_to_ptr.vmem [resolvable:$false] %s832_s9 }
  0x57   : > { %s834_s8 = scalar_lea.vmem %s833_s9, 4096  ;;  %p835_p10 = scmp.lt.s32.totalorder %s1228_s18, %s833_s9 }
  0x58   : > { %p830_p9 = pnand %p828_p7, %p814_p13  ;;  %p836_p6 = scmp.lt.s32.totalorder %s834_s8, %s827_s5 }
  0x5a   : > { %p831_p8 = pneg %p830_p9  ;;  %p837_p3 = por %p836_p6, %p835_p10 }
  0x5c   : > { %p838_p12 = pnand %p837_p3, %p831_p8 }
  0x5e   : > { %841 = shalt.err (!%p838_p12)
}
  0x5f   : > { %s996_s29 = smov 64   ;;  %s997_s28 = smov 4  }
  0x60   : > { %642 = dma.hbm_to_vmem [thread:$0]  (!%p1181_p11), %s1226_s24, 2048, %s1228_s18, %s1230_s27, %s996_s29, %s996_s29, %s997_s28  }
  0x61   : > { %200 = sbr.rel (%p1219_p0) target bundleno = 408 (0x198), region = 32  ;;  %s202_s11 = sand.u32 (!%p1219_p0), 1, %s968_s19  }
  0x62   : > { %s1261_s20 = sshll.u32 (!%p1219_p0), %s202_s11, 3  ;;  %s203_s10 = scalar_lea.sflag (!%p1219_p0), [#allocation4], %s202_s11 }
  0x63   : > { %s206_s5 = scalar_lea.vmem (!%p1219_p0), [#allocation3], %s1261_s20  ;;  %p1418_p13 = scmp.ne.s32.totalorder (!%p1219_p0), %s1405_s7, 0 }
  0x68   : > { %927 = dma.done.wait (%p1418_p13), %s203_s10, 128  }
  0x69   : > { %929 = vsyncadd (%p1418_p13), %s203_s10, 4294967168  ;;  %s211_s4 = sand.u32 1, %s956_s16   ;;  %p1419_p11 = scmp.ne.s32.totalorder %s1409_s26, 0 }
  0x6a   : > { %s579_s24 = sshll.u32 %s211_s4, 7  ;;  %s212_s18 = scalar_lea.sflag [#allocation7], %s211_s4 }
  0x6b   : > { %s1269_s15 = scalar_lea.vmem [#allocation6], %s579_s24 }
  0x6c   : > { %931 = dma.done.wait (%p1419_p11), %s212_s18, 2048  }
  0x6d   : > { %933 = vsyncadd (%p1419_p11), %s212_s18, 4294965248  ;;  %s240_s27 = sand.u32 1, %s944_s13   ;;  %p581_p0 = scmp.ne.s32.totalorder %s976_s21, 0 }
  0x6e   : > { %s1278_s14 = sshll.u32 %s240_s27, 2  ;;  %v998_v0 = vmov (!%p581_p0), 0.0  }
  0x6f   : > { %s242_s7 = scalar_lea.vmem [#allocation8], %s1278_s14  ;;  %249 = sbr.rel (%p581_p0) target bundleno = 118 (0x76), region = 44  ;;  %250 = vst [vmem:[#allocation2] sm:$0xff] (!%p581_p0), %v998_v0 }
  0x76 PF: > { %v764_v1 = vld [vmem:[%s1269_s15 + $0x40] sm:$0xff]   ;;  %v766_v3 = vld [vmem:[%s1269_s15 + $0x48] sm:$0xff]   ;;  %v768_v5 = vld [vmem:[%s1269_s15 + $0x50] sm:$0xff]   ;;  %p600_p1 = scmp.ne.s32.totalorder %s976_s21, 2 }
  0x77   : > { %v765_v2 = vld [vmem:[%s1269_s15] sm:$0xff]   ;;  %607 = vmatprep.subr.bf16.mxu0 %v764_v1  ;;  %v767_v4 = vld [vmem:[%s1269_s15 + $0x8] sm:$0xff]   ;;  %v769_v6 = vld [vmem:[%s1269_s15 + $0x10] sm:$0xff]  }
  0x78   : > { %608 = vmatpush3.bf16.msra.mxu0 %v765_v2  ;;  %v770_v7 = vld [vmem:[%s1269_s15 + $0x58] sm:$0xff]   ;;  %v772_v9 = vld [vmem:[%s1269_s15 + $0x60] sm:$0xff]   ;;  %v774_v11 = vld [vmem:[%s1269_s15 + $0x68] sm:$0xff]  }
  0x79   : > { %609 = vmatprep.subr.bf16.mxu0 %v766_v3  ;;  %v771_v8 = vld [vmem:[%s1269_s15 + $0x18] sm:$0xff]   ;;  %v773_v10 = vld [vmem:[%s1269_s15 + $0x20] sm:$0xff]   ;;  %v775_v14 = vld [vmem:[%s1269_s15 + $0x28] sm:$0xff]  }
  0x7a   : > { %v252_v12 = vld [vmem:[%s206_s5] sm:$0xff]  ;;  %v251_v21 = vld [vmem:[#allocation2] sm:$0xff] }
  0x7b   : > { %v583_v13 = vcombine.high %v252_v12, %v252_v12  ;;  %v776_v15 = vld [vmem:[%s1269_s15 + $0x70] sm:$0xff]   ;;  %v778_v17 = vld [vmem:[%s1269_s15 + $0x78] sm:$0xff]   ;;  %v582_v19 = vcombine.low %v252_v12, %v252_v12  ;;  %v601_v28 = vld [vmem:[%s1387_s2] ss:$0 sm:$0xff] (!%p600_p1) }
  0x7c   : > { %610 = vmatpush3.bf16.msra.mxu0 %v767_v4  ;;  %v777_v16 = vld [vmem:[%s1269_s15 + $0x30] sm:$0xff]   ;;  %v779_v18 = vld [vmem:[%s1269_s15 + $0x38] sm:$0xff]  }
  0x7d   : > { %611 = vmatprep.subr.bf16.mxu0 %v768_v5  ;;  %420 = vmatprep.mubr.bf16.mxu0 %v583_v13 }
  0x80   : > { %612 = vmatpush3.bf16.msra.mxu0 %v769_v6 }
  0x81   : > { %613 = vmatprep.subr.bf16.mxu0 %v770_v7 }
  0x84   : > { %614 = vmatpush3.bf16.msra.mxu0 %v771_v8 }
  0x85   : > { %615 = vmatprep.subr.bf16.mxu0 %v772_v9 }
  0x88   : > { %616 = vmatpush3.bf16.msra.mxu0 %v773_v10 }
  0x89   : > { %617 = vmatprep.subr.bf16.mxu0 %v774_v11 }
  0x8c   : > { %618 = vmatpush3.bf16.msra.mxu0 %v775_v14 }
  0x8d   : > { %619 = vmatprep.subr.bf16.mxu0 %v776_v15 }
  0x90   : > { %620 = vmatpush3.bf16.msra.mxu0 %v777_v16 }
  0x91   : > { %621 = vmatprep.subr.bf16.mxu0 %v778_v17 }
  0x94   : > { %622 = vmatpush3.bf16.msra.mxu0 %v779_v18 }
  0x97   : > { %421 = vmatmul.mubr.bf16.vlgmr.msra.gmra.mrb[0].mxu0 %v582_v19 }
 0x16a   : > { %v623_v20 = vpop.f32.mrb[0].mxu0  ;;  %433 = sbr.rel (%p600_p1) target bundleno = 383 (0x17f), region = 48 }
 0x16b   : > { %v624_v22 = vpop.f32.mrb[1].mxu0 }
 0x16c   : > { %v625_v23 = vadd.f32 %v624_v22, %v623_v20  ;;  %v626_v24 = vpop.f32.mrb[2].mxu0 }
 0x16d   : > { %v627_v25 = vpop.f32.mrb[3].mxu0 }
 0x16e   : > { %v428_v26 = vadd.f32 %v625_v23, %v251_v21 }
 0x170   : > { %429 = vst [vmem:[#allocation2] sm:$0xff] %v428_v26 }
 0x177   : > { %v434_v27 = vld [vmem:[#allocation2] sm:$0xff] }
 0x178   : > { %v442_v29 = vadd.f32 %v601_v28, %v434_v27 }
 0x17a   : > { %v443_v30 = vmax.f32 %v442_v29, 0.0 }
 0x17c   : > { %v444_v31 = vpack.c.bf16 %v443_v30, %v443_v30 }
 0x17e   : > { %445 = vst [vmem:[%s242_s7] sm:$0xf] %v444_v31 }
 0x17f PF: > { %s603_s8 = sshll.u32 %s980_s22, 6  ;;  %s460_s11 = sshll.u32 %s242_s7, 4  ;;  %s461_s11 = int_to_ptr.vmem [resolvable:$true] %s460_s11 }
 0x180   : > { %s1310_s28 = scalar_lea.hbm %s1388_s3, %s603_s8  ;;  %s447_s20 = scalar_lea.sflag [#allocation5], %s240_s27 }
 0x181   : > { %s842_s10 = scalar_lea.vmem %s461_s11, 64  ;;  %p1420_p4 = scmp.ne.s32.totalorder %s1413_s30, 0 }
 0x182   : > { %p843_p2 = scmp.ne.s32.totalorder %s461_s11, %s842_s10  ;;  %s999_s5 = smov [#allocation8]  }
 0x183   : > { %s846_s4 = sshll.u32 %s999_s5, 4  ;;  %s847_s4 = int_to_ptr.vmem [resolvable:$false] %s846_s4 }
 0x184   : > { %p844_p5 = pnand %p843_p2, %p1420_p4  ;;  %s848_s24 = scalar_lea.vmem %s847_s4, 128 }
 0x185   : > { %p849_p9 = scmp.lt.s32.totalorder %s461_s11, %s847_s4  ;;  %p850_p8 = scmp.lt.s32.totalorder %s848_s24, %s842_s10 }
 0x186   : > { %p845_p7 = pneg %p844_p5 }
 0x187   : > { %p851_p10 = por %p850_p8, %p849_p9 }
 0x189   : > { %p852_p6 = pnand %p851_p10, %p845_p7 }
 0x18b   : > { %855 = shalt.err (!%p852_p6)
}
 0x18c   : > { %s856_s22 = scalar_lea.hbm %s1310_s28, 64  ;;  %s860_s27 = scalar_lea.hbm %s1388_s3, 128 }
 0x18d   : > { %p857_p3 = scmp.ne.s32.totalorder %s1310_s28, %s856_s22  ;;  %p861_p11 = scmp.lt.u32.totalorder %s1310_s28, %s1388_s3 }
 0x18e   : > { %p862_p0 = scmp.lt.u32.totalorder %s860_s27, %s856_s22  ;;  %p864_p2 = scmp.lt.u32.totalorder %s856_s22, %s1310_s28 }
 0x18f   : > { %p858_p12 = pnand %p857_p3, %p1420_p4 }
 0x190   : > { %p863_p1 = por %p862_p0, %p861_p11 }
 0x191   : > { %p859_p13 = pneg %p858_p12 }
 0x192   : > { %p865_p5 = por %p864_p2, %p863_p1 }
 0x194   : > { %p866_p7 = pnand %p865_p5, %p859_p13 }
 0x196   : > { %869 = shalt.err (!%p866_p7)
}
 0x197   : > { %634 = dma.vmem_to_hbm [thread:$0]  (%p1420_p4), %s461_s11, 64, %s1310_s28, %s447_s20  }
 0x198 PF: > { %p648_p9 = scmp.ge.s32.totalorder %s992_s25, 2  ;;  %s472_s26 = sand.u32 1, %s940_s12  }
 0x199   : > { %p1421_p8 = scmp.ne.s32.totalorder %s1414_s6, 0  ;;  %s473_s9 = scalar_lea.sflag [#allocation5], %s472_s26 }
 0x19b   : > { %p644_p10 = pnand %p648_p9, %p1421_p8 }
 0x19d   : > { %935 = dma.done.wait (!%p644_p10), %s473_s9, 64  }
 0x19e   : > { %937 = vsyncadd (!%p644_p10), %s473_s9, 4294967232  ;;  %s22_s25 = sadd.s32 1, %s992_s25   ;;  %s1423_s30 = sld [smem:[#allocation12_spill]] }
 0x19f   : > { %p1338_p6 = scmp.ge.s32.totalorder %s22_s25, 8   ;;  %s1424_s14 = sld [smem:[#allocation19_spill]] }
 0x1a0   : > { %s1425_s29 = sld [smem:[#allocation17_spill]]  ;;  %s1426_s21 = sld [smem:[#allocation13_spill]] }
 0x1a1   : > { %s1427_s20 = sld [smem:[#allocation18_spill]]  ;;  %s1428_s22 = sld [smem:[#allocation14_spill]] }
 0x1a2   : > { %s1429_s6 = sld [smem:[#allocation15_spill]]  ;;  %s1430_s24 = sld [smem:[#allocation16_spill]] }
 0x1a3   : > { %s1431_s12 = smov %s944_s13  ;;  %s1433_s15 = smov %s956_s16 }
 0x1a4   : > { %s1432_s13 = smov %s1423_s30  ;;  %s1434_s16 = smov %s960_s17 }
 0x1a5   : > { %s1436_s18 = smov %s968_s19  ;;  %21 = sbr.rel (!%p1338_p6) target bundleno = 12 (0xc), region = 98 }
 0x1a6   : > { %s1435_s17 = smov %s1425_s29  ;;  %s1437_s19 = smov %s1426_s21 }
 0x1a7   : > { %s1438_s21 = smov %s984_s23 }
 0x1a8   : > { %s1439_s23 = smov %s1429_s6 }
 0x1ac   :  { %478 = vsyncpa [#allocation4], 1 }
 0x1ad   :  { %480 = vsyncpa [#allocation4 + $0x1], 1 }
 0x1ae   :  { %481 = vsyncpa [#allocation7], 1 }
 0x1af   :  { %483 = vsyncpa [#allocation7 + $0x1], 1 }
 0x1b0   :  { %484 = vsyncpa [#allocation5], 1 }
 0x1b1   :  { %486 = vsyncpa [#allocation5 + $0x1], 1 }

</bundles_post_ra>
